<compile_context>
chip_gen: v7x
topology: tpu7x:2x2x1
jax: 0.10.0
libtpu: 0.0.40
codegen_flags: <defaults>
</compile_context>

<pallas_src>
import functools

import jax
import jax.numpy as jnp
from jax.experimental import pallas as pl
from jax.experimental.pallas import tpu as pltpu


def _round_up(x: int, m: int) -> int:
    return ((x + m - 1) // m) * m


def actor_kernel(x_ref, w1_ref, b1_ref, w2_ref, b2_ref, o_ref):
    a = o_ref.shape[-1]  # real action_size (output block's lane dim == full dim)
    # fc1 + ReLU  (MXU matmul -> f32 accum, VPU max)
    x = x_ref[...]
    h = jnp.dot(x, w1_ref[...], preferred_element_type=jnp.float32) + b1_ref[...]
    h = jnp.maximum(h, 0.0)
    # fc3 + tanh  (MXU matmul -> f32 accum, EUP tanh); store only the real columns.
    y = jnp.dot(h, w2_ref[...], preferred_element_type=jnp.float32) + b2_ref[...]
    o_ref[...] = jnp.tanh(y[:, :a])


def prepare_actor_params(w1, b1, w2, b2):
    """One-time lane-dense (multiple-of-128) padding of the params.

    Zero padding is exact: padded hidden columns give relu(0)=0 contributions and
    padded action columns are never stored by the kernel.
    """
    S, H = w1.shape
    A = w2.shape[1]
    assert w2.shape == (H, A) and b1.shape == (1, H) and b2.shape == (1, A)
    H_pad = _round_up(H, 128)
    A_pad = _round_up(A, 128)
    w1p = jnp.pad(w1, ((0, 0), (0, H_pad - H)))
    b1p = jnp.pad(b1, ((0, 0), (0, H_pad - H)))
    w2p = jnp.pad(w2, ((0, H_pad - H), (0, A_pad - A)))
    b2p = jnp.pad(b2, ((0, 0), (0, A_pad - A)))
    return w1p, b1p, w2p, b2p


@functools.partial(jax.jit, static_argnames=("action_size", "tile_b"))
def actor_forward(state, w1p, b1p, w2p, b2p, *, action_size, tile_b=2048):
    """state: (B, state_size) f32 -> actions: (B, action_size) f32 in (-1, 1).

    Params must be the padded ones from `prepare_actor_params` (done once).
    """
    B, S = state.shape
    H_pad = w1p.shape[1]
    A_pad = w2p.shape[1]
    A = action_size
    assert w1p.shape == (S, H_pad) and b1p.shape == (1, H_pad)
    assert w2p.shape == (H_pad, A_pad) and b2p.shape == (1, A_pad)
    assert A <= A_pad

    # Batch tile: big enough to amortize per-step overhead, but split into at
    # least 2 grid steps when possible so v7x's two TensorCores both get work.
    TB = min(tile_b, max(8, _round_up(pl.cdiv(B, 2), 8)))
    TB = min(TB, _round_up(B, 8))
    grid = (pl.cdiv(B, TB),)  # ragged last block handled (row-wise compute, masked writeback)

    cost = pl.CostEstimate(
        flops=2 * B * (S * H_pad + H_pad * A_pad),
        transcendentals=B * A_pad,  # tanh
        bytes_accessed=4 * (B * S + S * H_pad + H_pad + H_pad * A_pad
                            + A_pad + B * A),
    )

    return pl.pallas_call(
        actor_kernel,
        out_shape=jax.ShapeDtypeStruct((B, A), jnp.float32),
        grid_spec=pltpu.PrefetchScalarGridSpec(
            num_scalar_prefetch=0,
            grid=grid,
            in_specs=[
                # x streams per batch tile
                pl.BlockSpec((TB, S), lambda i: (i, 0)),
                # weights / biases: constant index map -> VMEM-resident, no re-DMA
                pl.BlockSpec((S, H_pad), lambda i: (0, 0)),
                pl.BlockSpec((1, H_pad), lambda i: (0, 0)),
                pl.BlockSpec((H_pad, A_pad), lambda i: (0, 0)),
                pl.BlockSpec((1, A_pad), lambda i: (0, 0)),
            ],
            # Real-width output block: A equals the full array dim, TB multiple of 8.
            out_specs=pl.BlockSpec((TB, A), lambda i: (i, 0)),
        ),
        compiler_params=pltpu.CompilerParams(
            dimension_semantics=("parallel",),  # split batch tiles across TCs (v7x)
        ),
        cost_estimate=cost,
    )(state, w1p, b1p, w2p, b2p)


def init_actor_params(key, state_size, action_size, fc1_units=64):
    """Deterministic init mirroring nn.Linear's default U(-1/sqrt(fan_in), +...)."""
    k1, k2, k3, k4 = jax.random.split(key, 4)
    bound1 = 1.0 / jnp.sqrt(jnp.float32(state_size))
    bound2 = 1.0 / jnp.sqrt(jnp.float32(fc1_units))
    w1 = jax.random.uniform(k1, (state_size, fc1_units), jnp.float32, -bound1, bound1)
    b1 = jax.random.uniform(k2, (1, fc1_units), jnp.float32, -bound1, bound1)
    w2 = jax.random.uniform(k3, (fc1_units, action_size), jnp.float32, -bound2, bound2)
    b2 = jax.random.uniform(k4, (1, action_size), jnp.float32, -bound2, bound2)
    return w1, b1, w2, b2


def _reference(state, w1, b1, w2, b2):
    return jnp.tanh(jnp.maximum(state @ w1 + b1, 0.0) @ w2 + b2)


if __name__ == "__main__":
    key = jax.random.PRNGKey(0)
    k_state, k_big, k_params = jax.random.split(key, 3)

    state_size = 16
    action_size = 4
    fc1_units = 64
    w1, b1, w2, b2 = init_actor_params(k_params, state_size, action_size, fc1_units)
    # One-time parameter prep (hoisted out of the forward path).
    w1p, b1p, w2p, b2p = jax.block_until_ready(prepare_actor_params(w1, b1, w2, b2))

    # Small shapes consistent with the module (single grid tile).
    batch = 8
    state = jax.random.normal(k_state, (batch, state_size), dtype=jnp.float32)
    out = jax.block_until_ready(
        actor_forward(state, w1p, b1p, w2p, b2p, action_size=action_size))
    ref = _reference(state, w1, b1, w2, b2)
    assert out.shape == (batch, action_size)
    assert jnp.allclose(out, ref, atol=1e-5, rtol=1e-5)

    # Larger batch to exercise a multi-tile grid (2 parallel batch tiles).
    big_batch = 1024
    big_state = jax.random.normal(k_big, (big_batch, state_size), dtype=jnp.float32)
    big_out = jax.block_until_ready(
        actor_forward(big_state, w1p, b1p, w2p, b2p, action_size=action_size))
    big_ref = _reference(big_state, w1, b1, w2, b2)
    assert big_out.shape == (big_batch, action_size)
    assert jnp.allclose(big_out, big_ref, atol=1e-5, rtol=1e-5)

    # Non-multiple-of-tile batch to exercise the ragged (cdiv) last block.
    odd_batch = 100
    odd_state = jax.random.normal(k_big, (odd_batch, state_size), dtype=jnp.float32)
    odd_out = jax.block_until_ready(
        actor_forward(odd_state, w1p, b1p, w2p, b2p, action_size=action_size))
    odd_ref = _reference(odd_state, w1, b1, w2, b2)
    assert odd_out.shape == (odd_batch, action_size)
    assert jnp.allclose(odd_out, odd_ref, atol=1e-5, rtol=1e-5)

    print("KERNEL_OK")
</pallas_src>

<mosaic_0001>
module attributes {stable_mosaic.version = 11 : i64} {
  func.func @actor_kernel(%arg0: i32, %arg1: memref<8x16xf32, #tpu.memory_space<vmem>>, %arg2: memref<16x128xf32, #tpu.memory_space<vmem>>, %arg3: memref<1x128xf32, #tpu.memory_space<vmem>>, %arg4: memref<128x128xf32, #tpu.memory_space<vmem>>, %arg5: memref<1x128xf32, #tpu.memory_space<vmem>>, %arg6: memref<8x4xf32, #tpu.memory_space<vmem>>) attributes {dimension_semantics = [#tpu.dimension_semantics<parallel>], iteration_bounds = array<i64: 1>, scalar_prefetch = 0 : i64, scratch_operands = 0 : i64, tpu.core_type = #tpu.core_type<tc>, window_params = [{transform_indices = @transform_0, window_bounds = array<i64: 8, 16>}, {pipeline_mode = #tpu.pipeline_mode<synchronous>, transform_indices = @transform_1, window_bounds = array<i64: 16, 128>}, {pipeline_mode = #tpu.pipeline_mode<synchronous>, transform_indices = @transform_2, window_bounds = array<i64: 1, 128>}, {pipeline_mode = #tpu.pipeline_mode<synchronous>, transform_indices = @transform_3, window_bounds = array<i64: 128, 128>}, {pipeline_mode = #tpu.pipeline_mode<synchronous>, transform_indices = @transform_4, window_bounds = array<i64: 1, 128>}, {transform_indices = @transform_5, window_bounds = array<i64: 8, 4>}]} {
    %c0 = arith.constant 0 : index
    %c0_0 = arith.constant 0 : index
    %0 = vector.load %arg1[%c0, %c0_0] : memref<8x16xf32, #tpu.memory_space<vmem>>, vector<8x16xf32>
    %c0_1 = arith.constant 0 : index
    %c0_2 = arith.constant 0 : index
    %1 = vector.load %arg2[%c0_1, %c0_2] : memref<16x128xf32, #tpu.memory_space<vmem>>, vector<16x128xf32>
    %cst = arith.constant dense<0.000000e+00> : vector<8x128xf32>
    %2 = tpu.matmul %0, %1, %cst {dimension_numbers = #tpu.dot_dimension_numbers<[1], [0], [0], [1], [0, 0, 1, 1], [], []>} : vector<8x16xf32>, vector<16x128xf32>, vector<8x128xf32> -> vector<8x128xf32>
    %c0_3 = arith.constant 0 : index
    %c0_4 = arith.constant 0 : index
    %3 = vector.load %arg3[%c0_3, %c0_4] : memref<1x128xf32, #tpu.memory_space<vmem>>, vector<1x128xf32>
    %4 = vector.broadcast %3 : vector<1x128xf32> to vector<8x128xf32>
    %5 = arith.addf %2, %4 : vector<8x128xf32>
    %cst_5 = arith.constant 0.000000e+00 : f32
    %6 = vector.broadcast %cst_5 : f32 to vector<8x128xf32>
    %7 = arith.maximumf %5, %6 : vector<8x128xf32>
    %c0_6 = arith.constant 0 : index
    %c0_7 = arith.constant 0 : index
    %8 = vector.load %arg4[%c0_6, %c0_7] : memref<128x128xf32, #tpu.memory_space<vmem>>, vector<128x128xf32>
    %cst_8 = arith.constant dense<0.000000e+00> : vector<8x128xf32>
    %9 = tpu.matmul %7, %8, %cst_8 {dimension_numbers = #tpu.dot_dimension_numbers<[1], [0], [0], [1], [0, 0, 1, 1], [], []>} : vector<8x128xf32>, vector<128x128xf32>, vector<8x128xf32> -> vector<8x128xf32>
    %c0_9 = arith.constant 0 : index
    %c0_10 = arith.constant 0 : index
    %10 = vector.load %arg5[%c0_9, %c0_10] : memref<1x128xf32, #tpu.memory_space<vmem>>, vector<1x128xf32>
    %11 = vector.broadcast %10 : vector<1x128xf32> to vector<8x128xf32>
    %12 = arith.addf %9, %11 : vector<8x128xf32>
    %13 = vector.extract_strided_slice %12 {offsets = [0, 0], sizes = [8, 4], strides = [1, 1]} : vector<8x128xf32> to vector<8x4xf32>
    %14 = math.tanh %13 : vector<8x4xf32>
    %c0_11 = arith.constant 0 : index
    %c0_12 = arith.constant 0 : index
    %15 = vector.load %arg6[%c0_11, %c0_12] : memref<8x4xf32, #tpu.memory_space<vmem>>, vector<8x4xf32>
    tpu.vector_store %arg6[%c0_11, %c0_12], %14 {strides = array<i32>} : memref<8x4xf32, #tpu.memory_space<vmem>>, vector<8x4xf32>,
    return
  }
  func.func @transform_0(%arg0: i32) -> (i32, i32) {
    %c0_i32 = arith.constant 0 : i32
    %c0_i32_0 = arith.constant 0 : i32
    return %arg0, %c0_i32 : i32, i32
  }
  func.func @transform_1(%arg0: i32) -> (i32, i32) {
    %c0_i32 = arith.constant 0 : i32
    %c0_i32_0 = arith.constant 0 : i32
    %c0_i32_1 = arith.constant 0 : i32
    return %c0_i32, %c0_i32_0 : i32, i32
  }
  func.func @transform_2(%arg0: i32) -> (i32, i32) {
    %c0_i32 = arith.constant 0 : i32
    %c0_i32_0 = arith.constant 0 : i32
    %c0_i32_1 = arith.constant 0 : i32
    return %c0_i32, %c0_i32_0 : i32, i32
  }
  func.func @transform_3(%arg0: i32) -> (i32, i32) {
    %c0_i32 = arith.constant 0 : i32
    %c0_i32_0 = arith.constant 0 : i32
    %c0_i32_1 = arith.constant 0 : i32
    return %c0_i32, %c0_i32_0 : i32, i32
  }
  func.func @transform_4(%arg0: i32) -> (i32, i32) {
    %c0_i32 = arith.constant 0 : i32
    %c0_i32_0 = arith.constant 0 : i32
    %c0_i32_1 = arith.constant 0 : i32
    return %c0_i32, %c0_i32_0 : i32, i32
  }
  func.func @transform_5(%arg0: i32) -> (i32, i32) {
    %c0_i32 = arith.constant 0 : i32
    %c0_i32_0 = arith.constant 0 : i32
    return %arg0, %c0_i32 : i32, i32
  }
}

</mosaic_0001>

<bundles_post_ra>
// kernel: actor_forward.1
= control target key start
LH: loop header
LB: loop body
LE: loop exit
PB: predicated region body
PF: predicated region fallthrough
CT: control target
= control target key end

     0   :  { %10 = vsyncpa [#allocation3], 0  ;;  %s507_s0 = inlined_call_operand.hbm [shape: f32[8,16], index: 0, kind: input, shape index: {}]   ;;  %s508_s1 = inlined_call_operand.hbm [shape: f32[16,128], index: 1, kind: input, shape index: {}]   ;;  %s509_s2 = inlined_call_operand.vmem [shape: f32[1,128], index: 2, kind: input, shape index: {}]   ;;  %s510_s3 = inlined_call_operand.hbm [shape: f32[128,128], index: 3, kind: input, shape index: {}]   ;;  %s511_s4 = inlined_call_operand.vmem [shape: f32[1,128], index: 4, kind: input, shape index: {}]   ;;  %s512_s5 = inlined_call_operand.vmem [shape: f32[8,4], index: 5, kind: output, shape index: {}]  }
   0x1   :  { %11 = vsyncpa [#allocation5], 0  ;;  %s418_s18 = smov [#allocation4]   ;;  %s348_s22 = scalar_lea.hbm %s508_s1, 256 }
   0x2   :  { %s27_s19 = sshll.u32 %s418_s18, 4  ;;  %p349_p0 = scmp.ne.s32.totalorder %s508_s1, %s348_s22  ;;  %s28_s19 = int_to_ptr.vmem [resolvable:$true] %s27_s19 }
   0x3   :  { %p352_p1 = scmp.lt.u32.totalorder %s348_s22, %s508_s1 }
   0x5   :  { %p354_p2 = pnand %p352_p1, %p349_p0 }
   0x7   :  { %357 = shalt.err (!%p354_p2)
}
   0x8   :  { %s358_s27 = scalar_lea.vmem %s28_s19, 256  ;;  %p363_p4 = scmp.lt.s32.totalorder %s28_s19, %s28_s19 }
   0x9   :  { %p359_p3 = scmp.ne.s32.totalorder %s28_s19, %s358_s27  ;;  %p364_p5 = scmp.lt.s32.totalorder %s358_s27, %s358_s27 }
   0xb   :  { %p365_p6 = por %p364_p5, %p363_p4 }
   0xd   :  { %p366_p7 = pnand %p365_p6, %p359_p3 }
   0xf   :  { %369 = shalt.err (!%p366_p7)
}
  0x10   :  { %s419_s28 = smov 128   ;;  %s420_s29 = smov 8  }
  0x11   :  { %33 = dma.hbm_to_vmem [thread:$0]  %s508_s1, 256, %s28_s19, [#allocation5], %s419_s28, %s419_s28, %s420_s29  }
  0x12   :  { %s421_s7 = smov [#allocation2]   ;;  %s422_s9 = smov [#allocation6]  }
  0x13   :  { %s18_s8 = sshll.u32 %s421_s7, 4  ;;  %s41_s10 = sshll.u32 %s422_s9, 4  ;;  %s19_s8 = int_to_ptr.vmem [resolvable:$true] %s18_s8  ;;  %s42_s10 = int_to_ptr.vmem [resolvable:$true] %s41_s10 }
  0x14   :  { %s370_s13 = scalar_lea.hbm %s507_s0, 128 }
  0x15   :  { %p371_p8 = scmp.ne.s32.totalorder %s507_s0, %s370_s13  ;;  %p374_p9 = scmp.lt.u32.totalorder %s370_s13, %s507_s0 }
  0x17   :  { %p376_p10 = pnand %p374_p9, %p371_p8 }
  0x19   :  { %379 = shalt.err (!%p376_p10)
}
  0x1a   :  { %s380_s1 = scalar_lea.vmem %s19_s8, 128  ;;  %p385_p12 = scmp.lt.s32.totalorder %s19_s8, %s19_s8 }
  0x1b   :  { %p381_p11 = scmp.ne.s32.totalorder %s19_s8, %s380_s1  ;;  %p386_p13 = scmp.lt.s32.totalorder %s380_s1, %s380_s1 }
  0x1d   :  { %p387_p0 = por %p386_p13, %p385_p12 }
  0x1f   :  { %p388_p1 = pnand %p387_p0, %p381_p11 }
  0x21   :  { %391 = shalt.err (!%p388_p1)
}
  0x22   :  { %21 = dma.hbm_to_vmem [thread:$0]  %s507_s0, 128, %s19_s8, [#allocation3]  }
  0x23   :  { %s392_s22 = scalar_lea.hbm %s510_s3, 2048 }
  0x24   :  { %p393_p2 = scmp.ne.s32.totalorder %s510_s3, %s392_s22  ;;  %p396_p3 = scmp.lt.u32.totalorder %s392_s22, %s510_s3 }
  0x26   :  { %p398_p4 = pnand %p396_p3, %p393_p2 }
  0x28   :  { %401 = shalt.err (!%p398_p4)
}
  0x29   :  { %s402_s27 = scalar_lea.vmem %s42_s10, 2048  ;;  %p407_p6 = scmp.lt.s32.totalorder %s42_s10, %s42_s10 }
  0x2a   :  { %p403_p5 = scmp.ne.s32.totalorder %s42_s10, %s402_s27  ;;  %p408_p7 = scmp.lt.s32.totalorder %s402_s27, %s402_s27 }
  0x2c   :  { %p409_p8 = por %p408_p7, %p407_p6 }
  0x2e   :  { %p410_p9 = pnand %p409_p8, %p403_p5 }
  0x30   :  { %413 = shalt.err (!%p410_p9)
}
  0x31   :  { %47 = dma.hbm_to_vmem [thread:$0]  %s510_s3, 2048, %s42_s10, [#allocation5], %s419_s28, %s419_s28, %s420_s29  }
  0x32   :  { %414 = dma.done.wait [#allocation3], 128  }
  0x33   :  { %415 = vsyncadd [#allocation3], 4294967168 }
  0x34   :  { %416 = dma.done.wait [#allocation5], 2304  }
  0x35   :  { %417 = vsyncadd [#allocation5], 4294964992  ;;  %v423_v0 = vmov 0.0|0.0   ;;  %vm424_vm0 = vmmov 0   ;;  %v425_v1 = vmov 0.0   ;;  %v60_v2 = vld [vmem:[#allocation4] sm:$0xff] }
  0x36   :  { %311 = vmatprep.subr.bf16.mxu0 %v423_v0  ;;  %273 = vmatprep.mubr.msk.f32.mxu0 %vm424_vm0, %v425_v1  ;;  %v61_v3 = vld [vmem:[#allocation4 + $0x8] sm:$0xff]  ;;  %v144_v5 = vld [vmem:[#allocation6] sm:$0xff]  ;;  %v145_v6 = vld [vmem:[#allocation6 + $0x8] sm:$0xff]  ;;  %vm69_vm1 = vcmask 130048   ;;  %vm238_vm2 = vcmask 31744  }
  0x37   :  { %314 = vmatprep.subr.bf16.mxu1 %v423_v0  ;;  %308 = vmatprep.mubr.msk.f32.mxu1 %vm424_vm0, %v425_v1  ;;  %v312_v4 = vpack.c.bf16 %v61_v3, %v60_v2  ;;  %v146_v7 = vld [vmem:[#allocation6 + $0x10] sm:$0xff]  ;;  %v315_v8 = vpack.c.bf16 %v145_v6, %v144_v5  ;;  %v147_v9 = vld [vmem:[#allocation6 + $0x18] sm:$0xff]  ;;  %v59_v10 = vld [vmem:[#allocation2] sm:$0xff] }
  0x38   :  { %v318_v11 = vpack.c.bf16 %v147_v9, %v146_v7  ;;  %v148_v12 = vld [vmem:[#allocation6 + $0x20] sm:$0xff]  ;;  %v149_v13 = vld [vmem:[#allocation6 + $0x28] sm:$0xff]  ;;  %v150_v15 = vld [vmem:[#allocation6 + $0x30] sm:$0xff] }
  0x39   :  { %313 = vmatpush3.bf16.msra.mxu0 %v312_v4  ;;  %316 = vmatpush3.bf16.msra.mxu1 %v315_v8  ;;  %v321_v14 = vpack.c.bf16 %v149_v13, %v148_v12  ;;  %v151_v16 = vld [vmem:[#allocation6 + $0x38] sm:$0xff]  ;;  %v152_v18 = vld [vmem:[#allocation6 + $0x40] sm:$0xff]  ;;  %v153_v19 = vld [vmem:[#allocation6 + $0x48] sm:$0xff] }
  0x3a   :  { %317 = vmatprep.subr.bf16.mxu1 %v423_v0  ;;  %v324_v17 = vpack.c.bf16 %v151_v16, %v150_v15  ;;  %v327_v20 = vpack.c.bf16 %v153_v19, %v152_v18  ;;  %v154_v21 = vld [vmem:[#allocation6 + $0x50] sm:$0xff]  ;;  %v155_v22 = vld [vmem:[#allocation6 + $0x58] sm:$0xff]  ;;  %v156_v24 = vld [vmem:[#allocation6 + $0x60] sm:$0xff] }
  0x3b   :  { %v330_v23 = vpack.c.bf16 %v155_v22, %v154_v21  ;;  %v157_v25 = vld [vmem:[#allocation6 + $0x68] sm:$0xff]  ;;  %v158_v27 = vld [vmem:[#allocation6 + $0x70] sm:$0xff]  ;;  %v159_v28 = vld [vmem:[#allocation6 + $0x78] sm:$0xff] }
  0x3c   :  { %274 = vmatmul.mubr.msk.f32.vlgmr.msra.gmra.mrb[0].mxu0 %vm69_vm1, %v59_v10  ;;  %v333_v26 = vpack.c.bf16 %v157_v25, %v156_v24  ;;  %v336_v29 = vpack.c.bf16 %v159_v28, %v158_v27  ;;  %v246_v30 = vld [vmem:[%s509_s2] ss:$0 sm:$0xff] }
  0x3d   :  { %319 = vmatpush3.bf16.msra.mxu1 %v318_v11  ;;  %v248_v35 = vld [vmem:[%s511_s4] ss:$0 sm:$0xff] }
  0x3e   :  { %320 = vmatprep.subr.bf16.mxu1 %v423_v0 }
  0x41   :  { %322 = vmatpush3.bf16.msra.mxu1 %v321_v14 }
  0x42   :  { %323 = vmatprep.subr.bf16.mxu1 %v423_v0 }
  0x45   :  { %325 = vmatpush3.bf16.msra.mxu1 %v324_v17 }
  0x46   :  { %326 = vmatprep.subr.bf16.mxu1 %v423_v0 }
  0x49   :  { %328 = vmatpush3.bf16.msra.mxu1 %v327_v20 }
  0x4a   :  { %329 = vmatprep.subr.bf16.mxu1 %v423_v0 }
  0x4d   :  { %331 = vmatpush3.bf16.msra.mxu1 %v330_v23 }
  0x4e   :  { %332 = vmatprep.subr.bf16.mxu1 %v423_v0 }
  0x51   :  { %334 = vmatpush3.bf16.msra.mxu1 %v333_v26 }
  0x52   :  { %335 = vmatprep.subr.bf16.mxu1 %v423_v0 }
  0x55   :  { %337 = vmatpush3.bf16.msra.mxu1 %v336_v29 }
 0x10f   :  { %v139_v31 = vpop.f32.mrb[0].mxu0 }
 0x110   :  { %v140_v32 = vadd.f32 %v246_v30, %v139_v31  ;;  %v275_v33 = vpop.f32.mrb[1].mxu0 }
 0x112   :  { %v143_v34 = vmax.f32 %v140_v32, 0.0 }
 0x114   :  { %309 = vmatmul.mubr.f32.vlgmr.msra.gmra.mrb[0].mxu1 %v143_v34 }
 0x1e7   :  { %v233_v36 = vpop.f32.mrb[0].mxu1 }
 0x1e8   :  { %v234_v37 = vadd.f32 %v248_v35, %v233_v36  ;;  %v310_v38 = vpop.f32.mrb[1].mxu1 }
 0x1ea   :  { %346 = vtanh.f32 %v234_v37 }
 0x1f4   :  { %v347_v39 = vpop.eup %346 }
 0x1f5   :  { %239 = vst.msk [vmem:[%s512_s5] sm:$0xff] %vm238_vm2, %v347_v39 }
 0x1f6   :  { %244 = vsyncpa [#allocation3], 1 }
 0x1f7   :  { %245 = vsyncpa [#allocation5], 1 }

</bundles_post_ra>
